<compile_context>
chip_gen: v7x
topology: tpu7x:2x2x1
jax: 0.10.0
libtpu: 0.0.40
codegen_flags: <defaults>
</compile_context>

<pallas_src>
import jax
import jax.numpy as jnp
from jax.experimental import pallas as pl
from jax.experimental.pallas import tpu as pltpu


def _bilinear_weight_matrix(out_size: int, in_size: int) -> jnp.ndarray:
    """Row-stochastic [out_size, in_size] bilinear matrix (cv2 half-pixel, edge clamp).

    Built from broadcast comparisons -- no (in_size x in_size) identity is materialized.
    """
    scale = in_size / out_size
    src = (jnp.arange(out_size, dtype=jnp.float32) + 0.5) * scale - 0.5
    x0 = jnp.floor(src)
    frac = src - x0
    x0c = jnp.clip(x0.astype(jnp.int32), 0, in_size - 1)
    x1c = jnp.clip(x0.astype(jnp.int32) + 1, 0, in_size - 1)
    cols = jnp.arange(in_size, dtype=jnp.int32)[None, :]
    w = ((1.0 - frac)[:, None] * (cols == x0c[:, None]).astype(jnp.float32)
         + frac[:, None] * (cols == x1c[:, None]).astype(jnp.float32))
    return w  # (out_size, in_size)


def _resize_normalize_kernel(x_ref, wy_ref, wxc_ref, off_ref, out_ref):
    # x_ref:   (H_in, W_in*C)     HWC image, lanes = interleaved (w, c)   -- free reshape of HWC
    # wy_ref:  (H_out, H_in)      row-resize matrix
    # wxc_ref: (W_in*C, C*W_out)  col-resize + channel de-interleave + 1/(255*std) scale
    # off_ref: (1, C*W_out)       per-output-channel -mean/std offsets
    # out_ref: (H_out, C*W_out)   lane-dense output slab
    a = jnp.dot(wy_ref[...], x_ref[...], preferred_element_type=jnp.float32)   # (H_out, W_in*C)
    b = jnp.dot(a, wxc_ref[...], preferred_element_type=jnp.float32)           # (H_out, C*W_out)
    out_ref[...] = b + off_ref[...]


def _vmem_footprint_bytes(*shapes, itemsize=4):
    """f32 VMEM footprint with last-two-dims padded to (8, 128)."""
    total = 0
    for s in shapes:
        s = tuple(int(d) for d in s)
        if len(s) == 1:
            s = (1,) + s
        lead = 1
        for d in s[:-2]:
            lead *= d
        sub = -(-s[-2] // 8) * 8
        lane = -(-s[-1] // 128) * 128
        total += itemsize * lead * sub * lane
    return total


def validation_augmentation(x_hwc, label, *, image_size, image_mean, image_std):
    """Equivalent of ValidationAugmentation.forward. x_hwc: (H, W, C) float32 in [0, 255]."""
    H_in, W_in, C = x_hwc.shape
    H_out = W_out = int(image_size)

    # Free, contiguous view of the HWC image (no HBM transpose before the kernel).
    x_flat = x_hwc.astype(jnp.float32).reshape(H_in, W_in * C)

    # Glue: resize matrices + fused normalization constants.
    wy = _bilinear_weight_matrix(H_out, H_in)                       # (H_out, H_in)
    wx = _bilinear_weight_matrix(W_out, W_in)                       # (W_out, W_in)
    mean = jnp.asarray(image_mean, jnp.float32)
    std = jnp.asarray(image_std, jnp.float32)
    scale = 1.0 / (std * 255.0)                                     # (C,)
    offset = -mean / std                                            # (C,)

    # Wxc[w*C + c, c'*W_out + p] = (c == c') * wx[p, w] * scale[c']
    eye_c = jnp.eye(C, dtype=jnp.float32)                           # (C, C) -- tiny
    wxc = (eye_c[None, :, :, None]
           * wx.T[:, None, None, :]
           * scale[None, None, :, None]).reshape(W_in * C, C * W_out)
    off_row = jnp.repeat(offset, W_out).reshape(1, C * W_out)

    footprint = _vmem_footprint_bytes(
        (H_in, W_in * C), (H_out, H_in), (W_in * C, C * W_out),
        (1, C * W_out), (H_out, C * W_out), (H_out, W_in * C),
    )
    vmem_limit = min(max(4 * footprint, 4 * 1024 * 1024), 48 * 1024 * 1024)

    slab = pl.pallas_call(
        _resize_normalize_kernel,
        out_shape=jax.ShapeDtypeStruct((H_out, C * W_out), jnp.float32),
        compiler_params=pltpu.CompilerParams(vmem_limit_bytes=vmem_limit),
    )(x_flat, wy, wxc, off_row)

    # ToTensorV2: CHW. Cheap layout plumbing on the already-resized (small) output.
    image = slab.reshape(H_out, C, W_out).transpose(1, 0, 2)        # (C, H_out, W_out)

    return {"image": image, "label": label}


def _reference(x_hwc, image_size, image_mean, image_std):
    """Pure-JAX reference of resize->normalize->CHW for correctness check."""
    H_in, W_in, C = x_hwc.shape
    wy = _bilinear_weight_matrix(image_size, H_in)
    wx = _bilinear_weight_matrix(image_size, W_in)
    x_chw = jnp.transpose(x_hwc, (2, 0, 1)).astype(jnp.float32)
    resized = jnp.einsum("oh,chw,pw->cop", wy, x_chw, wx)
    mean = jnp.asarray(image_mean, jnp.float32).reshape(C, 1, 1)
    std = jnp.asarray(image_std, jnp.float32).reshape(C, 1, 1)
    return (resized - mean * 255.0) / (std * 255.0)


if __name__ == "__main__":
    key = jax.random.PRNGKey(0)
    k_img, k_lbl = jax.random.split(key)

    H_in, W_in, C = 24, 20, 3
    image_size = 16
    image_mean = (0.485, 0.456, 0.406)
    image_std = (0.229, 0.224, 0.225)

    # Synthetic image in [0, 255] (HWC, as albumentations expects) and a dummy label.
    x = jax.random.uniform(k_img, (H_in, W_in, C), jnp.float32, 0.0, 255.0)
    label = jax.random.randint(k_lbl, (1,), 0, 10)

    out = validation_augmentation(
        x, label, image_size=image_size, image_mean=image_mean, image_std=image_std
    )
    img_out = jax.block_until_ready(out["image"])

    ref = _reference(x, image_size, image_mean, image_std)
    assert img_out.shape == (C, image_size, image_size)
    assert jnp.allclose(img_out, ref, atol=1e-4, rtol=1e-4)

    print("KERNEL_OK")
</pallas_src>

<mosaic_0001>
module attributes {stable_mosaic.version = 11 : i64} {
  func.func @_resize_normalize_kernel(%arg0: memref<24x60xf32, #tpu.memory_space<vmem>>, %arg1: memref<16x24xf32, #tpu.memory_space<vmem>>, %arg2: memref<60x48xf32, #tpu.memory_space<vmem>>, %arg3: memref<1x48xf32, #tpu.memory_space<vmem>>, %arg4: memref<16x48xf32, #tpu.memory_space<vmem>>) attributes {dimension_semantics = [], scalar_prefetch = 0 : i64, scratch_operands = 0 : i64, tpu.core_type = #tpu.core_type<tc>} {
    %c0 = arith.constant 0 : index
    %c0_0 = arith.constant 0 : index
    %0 = vector.load %arg1[%c0, %c0_0] : memref<16x24xf32, #tpu.memory_space<vmem>>, vector<16x24xf32>
    %c0_1 = arith.constant 0 : index
    %c0_2 = arith.constant 0 : index
    %1 = vector.load %arg0[%c0_1, %c0_2] : memref<24x60xf32, #tpu.memory_space<vmem>>, vector<24x60xf32>
    %cst = arith.constant dense<0.000000e+00> : vector<16x60xf32>
    %2 = tpu.matmul %0, %1, %cst {dimension_numbers = #tpu.dot_dimension_numbers<[1], [0], [0], [1], [0, 0, 1, 1], [], []>} : vector<16x24xf32>, vector<24x60xf32>, vector<16x60xf32> -> vector<16x60xf32>
    %c0_3 = arith.constant 0 : index
    %c0_4 = arith.constant 0 : index
    %3 = vector.load %arg2[%c0_3, %c0_4] : memref<60x48xf32, #tpu.memory_space<vmem>>, vector<60x48xf32>
    %cst_5 = arith.constant dense<0.000000e+00> : vector<16x48xf32>
    %4 = tpu.matmul %2, %3, %cst_5 {dimension_numbers = #tpu.dot_dimension_numbers<[1], [0], [0], [1], [0, 0, 1, 1], [], []>} : vector<16x60xf32>, vector<60x48xf32>, vector<16x48xf32> -> vector<16x48xf32>
    %c0_6 = arith.constant 0 : index
    %c0_7 = arith.constant 0 : index
    %5 = vector.load %arg3[%c0_6, %c0_7] : memref<1x48xf32, #tpu.memory_space<vmem>>, vector<1x48xf32>
    %6 = vector.broadcast %5 : vector<1x48xf32> to vector<16x48xf32>
    %7 = arith.addf %4, %6 : vector<16x48xf32>
    %c0_8 = arith.constant 0 : index
    %c0_9 = arith.constant 0 : index
    %8 = vector.load %arg4[%c0_8, %c0_9] : memref<16x48xf32, #tpu.memory_space<vmem>>, vector<16x48xf32>
    tpu.vector_store %arg4[%c0_8, %c0_9], %7 {strides = array<i32>} : memref<16x48xf32, #tpu.memory_space<vmem>>, vector<16x48xf32>,
    return
  }
}

</mosaic_0001>

<bundles_post_ra>
// kernel: tpu_custom_call.1
= control target key start
LH: loop header
LB: loop body
LE: loop exit
PB: predicated region body
PF: predicated region fallthrough
CT: control target
= control target key end

     0   :  { %vm23_vm0 = vcmask 195584   ;;  %s409_s0 = inlined_call_operand.vmem [shape: f32[24,60], index: 0, kind: input, shape index: {}]   ;;  %s410_s1 = inlined_call_operand.vmem [shape: f32[16,24], index: 1, kind: input, shape index: {}]   ;;  %s411_s2 = inlined_call_operand.vmem [shape: f32[60,48], index: 2, kind: input, shape index: {}]   ;;  %s412_s3 = inlined_call_operand.vmem [shape: f32[1,48], index: 3, kind: input, shape index: {}]   ;;  %s413_s4 = inlined_call_operand.hbm [shape: f32[16,48], index: 4, kind: output, shape index: {}]  }
   0x1   :  { %v20_v0 = vld [vmem:[%s409_s0] sm:$0xff]  ;;  %v21_v1 = vld [vmem:[%s409_s0 + $0x8] sm:$0xff]  ;;  %v22_v3 = vld [vmem:[%s409_s0 + $0x10] sm:$0xff] }
   0x2   :  { %v274_v2 = vpack.c.bf16 %v21_v1, %v20_v0  ;;  %v18_v4 = vld [vmem:[%s410_s1] sm:$0xff]  ;;  %v106_v6 = vld [vmem:[%s411_s2 + $0x8] sm:$0xff]  ;;  %v107_v7 = vld [vmem:[%s411_s2 + $0x10] sm:$0xff] }
   0x3   :  { %v105_v5 = vld [vmem:[%s411_s2] sm:$0xff]  ;;  %252 = vmatprep.mubr.msk.f32.mxu0 %vm23_vm0, %v18_v4  ;;  %v108_v8 = vld [vmem:[%s411_s2 + $0x18] sm:$0xff]  ;;  %v110_v12 = vld [vmem:[%s411_s2 + $0x28] sm:$0xff] }
   0x4   :  { %275 = vmatprep.subr.bf16.mxu0 %v274_v2  ;;  %v278_v9 = vpack.c.bf16 %v106_v6, %v105_v5  ;;  %v282_v10 = vpack.c.bf16 %v108_v8, %v107_v7  ;;  %v109_v11 = vld [vmem:[%s411_s2 + $0x20] sm:$0xff] }
   0x5   :  { %277 = vmatpush3.bf16.msra.mxu0 %v274_v2 }
   0x6   :  { %250 = vmatprep.subr.mxu0 %v22_v3  ;;  %279 = vmatprep.subr.bf16.mxu1 %v278_v9 }
   0x7   :  { %9 = vsyncpa [#allocation3], 0  ;;  %v19_v13 = vld [vmem:[%s410_s1 + $0x8] sm:$0xff]  ;;  %281 = vmatpush3.bf16.msra.mxu1 %v278_v9  ;;  %v286_v14 = vpack.c.bf16 %v110_v12, %v109_v11  ;;  %v111_v15 = vld [vmem:[%s411_s2 + $0x30] sm:$0xff]  ;;  %vm127_vm1 = vcmask 1043456   ;;  %vm324_vm2 = vmmov 1  }
   0x8   :  { %283 = vmatprep.subr.bf16.mxu1 %v282_v10  ;;  %v112_v16 = vld [vmem:[%s411_s2 + $0x38] sm:$0xf]  ;;  %vm291_vm3 = vmpackc.low %vm127_vm1, %vm324_vm2  ;;  %vm120_vm4 = vcmask 490496   ;;  %v227_v20 = vld [vmem:[%s412_s3] ss:$0 sm:$0xff]  ;;  %s325_s2 = smov [#allocation2]  }
   0x9   :  { %251 = vmatpush3.msra.mxu0 %v22_v3  ;;  %v290_v17 = vpack.c.bf16 %v112_v16, %v111_v15  ;;  %s214_s15 = sshll.u32 %s325_s2, 4  ;;  %vm206_vm5 = vcmask 392192   ;;  %s215_s15 = int_to_ptr.vmem [resolvable:$true] %s214_s15 }
   0xa   :  { %253 = vmatmul.mubr.msk.f32.vlgmr.msra.gmra.mrb[0].mxu0 %vm23_vm0, %v19_v13  ;;  %s300_s16 = scalar_lea.vmem %s215_s15, 256  ;;  %p305_p1 = scmp.lt.s32.totalorder %s215_s15, %s215_s15 }
   0xb   :  { %285 = vmatpush3.bf16.msra.mxu1 %v282_v10  ;;  %p301_p0 = scmp.ne.s32.totalorder %s215_s15, %s300_s16  ;;  %p306_p2 = scmp.lt.s32.totalorder %s300_s16, %s300_s16 }
   0xc   :  { %287 = vmatprep.subr.bf16.mxu1 %v286_v14 }
   0xd   :  { %p307_p3 = por %p306_p2, %p305_p1 }
   0xf   :  { %289 = vmatpush3.bf16.msra.mxu1 %v286_v14  ;;  %p308_p4 = pnand %p307_p3, %p301_p0 }
  0x10   :  { %292 = vmatprep.subr.msk.bf16.mxu1 %vm291_vm3, %v290_v17 }
  0x13   :  { %295 = vmatpush3.bf16.msk.msra.mxu1 %vm291_vm3, %v290_v17 }
  0xdd   :  { %v254_v18 = vpop.f32.mrb[0].mxu0 }
  0xde   :  { %v96_v19 = vpop.f32.mrb[1].mxu0 }
  0xdf   :  { %271 = vmatprep.mubr.msk.f32.mxu1 %vm120_vm4, %v96_v19 }
  0xe0   :  { %272 = vmatmul.mubr.msk.f32.vlgmr.msra.gmra.mrb[0].mxu1 %vm120_vm4, %v254_v18 }
 0x1b3   :  { %v273_v21 = vpop.f32.mrb[0].mxu1 }
 0x1b4   :  { %v203_v22 = vadd.f32 %v273_v21, %v227_v20  ;;  %v197_v23 = vpop.f32.mrb[1].mxu1 }
 0x1b5   :  { %v198_v24 = vadd.f32 %v227_v20, %v197_v23 }
 0x1b6   :  { %208 = vst.msk [vmem:[#allocation2 + $0x8] sm:$0xff] %vm206_vm5, %v203_v22 }
 0x1b7   :  { %207 = vst.msk [vmem:[#allocation2] sm:$0xff] %vm206_vm5, %v198_v24 }
 0x1b8   :  { %311 = shalt.err (!%p308_p4)
}
 0x1b9   :  { %s312_s3 = scalar_lea.hbm %s413_s4, 256 }
 0x1ba   :  { %p313_p5 = scmp.ne.s32.totalorder %s413_s4, %s312_s3  ;;  %p316_p6 = scmp.lt.u32.totalorder %s312_s3, %s413_s4 }
 0x1bc   :  { %p318_p7 = pnand %p316_p6, %p313_p5 }
 0x1be   :  { %321 = shalt.err (!%p318_p7)
}
 0x1bf   :  { %s326_s23 = smov 128   ;;  %s327_s24 = smov 8  }
 0x1c0   :  { %220 = dma.vmem_to_hbm [thread:$0]  %s215_s15, 256, %s413_s4, [#allocation3], %s326_s23, %s326_s23, %s327_s24  }
 0x1c1   :  { %322 = dma.done.wait [#allocation3], 256  }
 0x1c2   :  { %323 = vsyncadd [#allocation3], 4294967040 }
 0x1c3   :  { %224 = vsyncpa [#allocation3], 1 }

</bundles_post_ra>
